<compile_context>
chip_gen: v7x
topology: tpu7x:2x2x1
jax: 0.10.0
libtpu: 0.0.40
codegen_flags: <defaults>
</compile_context>

<pallas_src>
import jax
import jax.numpy as jnp
from jax.experimental import pallas as pl
from jax.experimental.pallas import tpu as pltpu

_LANE = 128  # TPU vreg lane width


def _round_up(n, m):
    return ((n + m - 1) // m) * m


def _net_kernel(x_ref, w1_ref, b1_ref, w2_ref, b2_ref, o_ref):
    # Fused MLP forward on one batch tile: (x @ W1 + b1) -> ReLU -> (@ W2 + b2)
    x = x_ref[...]                                      # (TB, F)   unpadded lanes
    h = jnp.dot(x, w1_ref[...],
                preferred_element_type=jnp.float32)     # (TB, H_pad)  MXU, K=F masked
    h = jnp.maximum(h + b1_ref[...], 0.0)               # bias + ReLU (VPU)
    y = jnp.dot(h, w2_ref[...],
                preferred_element_type=jnp.float32)     # (TB, O)  MXU
    y = y + b2_ref[...]                                 # VPU broadcast (1, O)
    o_ref[...] = y.astype(o_ref.dtype)                  # tiny unpadded store


def prepare_params(w1, b1, w2, b2):
    """Pad the hidden dim (100 -> 128 lanes) ONCE at init time.

    w1: (F, H); b1: (H,); w2: (H, O); b2: (O,).  Padded hidden columns of W1
    get bias 0 -> ReLU(0)=0 -> multiplied by zero rows of W2, so results are
    bit-identical to the unpadded math.
    """
    F, H = w1.shape
    O = w2.shape[1]
    H_pad = _round_up(H, _LANE)
    f32 = jnp.float32
    w1p = jnp.zeros((F, H_pad), f32).at[:, :H].set(w1.astype(f32))
    b1p = jnp.zeros((1, H_pad), f32).at[0, :H].set(b1.astype(f32))
    w2p = jnp.zeros((H_pad, O), f32).at[:H, :].set(w2.astype(f32))
    b2p = b2.reshape(1, O).astype(f32)
    return w1p, b1p, w2p, b2p


def net_forward(x, w1p, b1p, w2p, b2p, *, block_b=1024):
    """x: (B, F) unpadded; params pre-padded via prepare_params. Returns (B, O)."""
    B, F = x.shape
    Fw, H_pad = w1p.shape
    O = w2p.shape[1]
    assert Fw == F, "w1p first dim must match x feature dim"

    # Batch tile: multiple of 8 sublanes; at least 2 grid steps for medium B so
    # v7x's two TensorCores both get work; capped at block_b rows for large B.
    TB = min(block_b, max(8, _round_up(pl.cdiv(B, 2), 8)))
    grid = (pl.cdiv(B, TB),)

    flops = 2 * B * (F * H_pad + H_pad * O)
    bytes_accessed = 4 * (B * F + F * H_pad + H_pad + H_pad * O + O + B * O)

    return pl.pallas_call(
        _net_kernel,
        out_shape=jax.ShapeDtypeStruct((B, O), x.dtype),
        grid_spec=pltpu.PrefetchScalarGridSpec(
            num_scalar_prefetch=0,
            grid=grid,
            in_specs=[
                pl.BlockSpec((TB, F), lambda i: (i, 0)),        # x: tiled over batch, lanes unpadded
                pl.BlockSpec((F, H_pad), lambda i: (0, 0)),     # weights resident across steps
                pl.BlockSpec((1, H_pad), lambda i: (0, 0)),
                pl.BlockSpec((H_pad, O), lambda i: (0, 0)),
                pl.BlockSpec((1, O), lambda i: (0, 0)),
            ],
            out_specs=pl.BlockSpec((TB, O), lambda i: (i, 0)),  # unpadded output columns
        ),
        compiler_params=pltpu.CompilerParams(
            dimension_semantics=("parallel",)),                  # batch axis independent
        cost_estimate=pl.CostEstimate(
            flops=flops, transcendentals=0, bytes_accessed=bytes_accessed),
    )(x, w1p, b1p, w2p, b2p)


def _ref_forward(x, w1, b1, w2, b2):
    h = jnp.maximum(x @ w1 + b1, 0.0)
    return h @ w2 + b2


if __name__ == "__main__":
    # Shapes consistent with the module: n_feature=13 (housing features),
    # hidden=100 (fixed by the module), n_output=1, small batch.
    B, F, HID, O = 8, 13, 100, 1

    key = jax.random.PRNGKey(0)
    kx, kw1, kb1, kw2, kb2 = jax.random.split(key, 5)

    x = jax.random.normal(kx, (B, F), dtype=jnp.float32)

    # Deterministic init mimicking PyTorch nn.Linear: U(-1/sqrt(fan_in), +1/sqrt(fan_in)).
    lim1 = 1.0 / jnp.sqrt(jnp.float32(F))
    lim2 = 1.0 / jnp.sqrt(jnp.float32(HID))
    # Stored pre-transposed as (in, out).
    w1 = jax.random.uniform(kw1, (F, HID), jnp.float32, -lim1, lim1)
    b1 = jax.random.uniform(kb1, (HID,), jnp.float32, -lim1, lim1)
    w2 = jax.random.uniform(kw2, (HID, O), jnp.float32, -lim2, lim2)
    b2 = jax.random.uniform(kb2, (O,), jnp.float32, -lim2, lim2)

    # Pad hidden dim once at "model init" time (hoisted out of the forward).
    params = prepare_params(w1, b1, w2, b2)

    out = net_forward(x, *params)
    out = jax.block_until_ready(out)

    ref = _ref_forward(x, w1, b1, w2, b2)
    assert out.shape == (B, O)
    assert jnp.allclose(out, ref, atol=1e-5, rtol=1e-5)

    print("KERNEL_OK")
</pallas_src>

<mosaic_0001>
module attributes {stable_mosaic.version = 11 : i64} {
  func.func @_net_kernel(%arg0: i32, %arg1: memref<8x13xf32, #tpu.memory_space<vmem>>, %arg2: memref<13x128xf32, #tpu.memory_space<vmem>>, %arg3: memref<1x128xf32, #tpu.memory_space<vmem>>, %arg4: memref<128x1xf32, #tpu.memory_space<vmem>>, %arg5: memref<1x1xf32, #tpu.memory_space<vmem>>, %arg6: memref<8x1xf32, #tpu.memory_space<vmem>>) attributes {dimension_semantics = [#tpu.dimension_semantics<parallel>], iteration_bounds = array<i64: 1>, scalar_prefetch = 0 : i64, scratch_operands = 0 : i64, tpu.core_type = #tpu.core_type<tc>, window_params = [{transform_indices = @transform_0, window_bounds = array<i64: 8, 13>}, {pipeline_mode = #tpu.pipeline_mode<synchronous>, transform_indices = @transform_1, window_bounds = array<i64: 13, 128>}, {pipeline_mode = #tpu.pipeline_mode<synchronous>, transform_indices = @transform_2, window_bounds = array<i64: 1, 128>}, {pipeline_mode = #tpu.pipeline_mode<synchronous>, transform_indices = @transform_3, window_bounds = array<i64: 128, 1>}, {pipeline_mode = #tpu.pipeline_mode<synchronous>, transform_indices = @transform_4, window_bounds = array<i64: 1, 1>}, {transform_indices = @transform_5, window_bounds = array<i64: 8, 1>}]} {
    %c0 = arith.constant 0 : index
    %c0_0 = arith.constant 0 : index
    %0 = vector.load %arg1[%c0, %c0_0] : memref<8x13xf32, #tpu.memory_space<vmem>>, vector<8x13xf32>
    %c0_1 = arith.constant 0 : index
    %c0_2 = arith.constant 0 : index
    %1 = vector.load %arg2[%c0_1, %c0_2] : memref<13x128xf32, #tpu.memory_space<vmem>>, vector<13x128xf32>
    %cst = arith.constant dense<0.000000e+00> : vector<8x128xf32>
    %2 = tpu.matmul %0, %1, %cst {dimension_numbers = #tpu.dot_dimension_numbers<[1], [0], [0], [1], [0, 0, 1, 1], [], []>} : vector<8x13xf32>, vector<13x128xf32>, vector<8x128xf32> -> vector<8x128xf32>
    %c0_3 = arith.constant 0 : index
    %c0_4 = arith.constant 0 : index
    %3 = vector.load %arg3[%c0_3, %c0_4] : memref<1x128xf32, #tpu.memory_space<vmem>>, vector<1x128xf32>
    %4 = vector.broadcast %3 : vector<1x128xf32> to vector<8x128xf32>
    %5 = arith.addf %2, %4 : vector<8x128xf32>
    %cst_5 = arith.constant 0.000000e+00 : f32
    %6 = vector.broadcast %cst_5 : f32 to vector<8x128xf32>
    %7 = arith.maximumf %5, %6 : vector<8x128xf32>
    %c0_6 = arith.constant 0 : index
    %c0_7 = arith.constant 0 : index
    %8 = vector.load %arg4[%c0_6, %c0_7] : memref<128x1xf32, #tpu.memory_space<vmem>>, vector<128x1xf32>
    %cst_8 = arith.constant dense<0.000000e+00> : vector<8x1xf32>
    %9 = tpu.matmul %7, %8, %cst_8 {dimension_numbers = #tpu.dot_dimension_numbers<[1], [0], [0], [1], [0, 0, 1, 1], [], []>} : vector<8x128xf32>, vector<128x1xf32>, vector<8x1xf32> -> vector<8x1xf32>
    %c0_9 = arith.constant 0 : index
    %c0_10 = arith.constant 0 : index
    %10 = vector.load %arg5[%c0_9, %c0_10] : memref<1x1xf32, #tpu.memory_space<vmem>>, vector<1x1xf32>
    %11 = vector.broadcast %10 : vector<1x1xf32> to vector<8x1xf32>
    %12 = arith.addf %9, %11 : vector<8x1xf32>
    %c0_11 = arith.constant 0 : index
    %c0_12 = arith.constant 0 : index
    %13 = vector.load %arg6[%c0_11, %c0_12] : memref<8x1xf32, #tpu.memory_space<vmem>>, vector<8x1xf32>
    tpu.vector_store %arg6[%c0_11, %c0_12], %12 {strides = array<i32>} : memref<8x1xf32, #tpu.memory_space<vmem>>, vector<8x1xf32>,
    return
  }
  func.func @transform_0(%arg0: i32) -> (i32, i32) {
    %c0_i32 = arith.constant 0 : i32
    %c0_i32_0 = arith.constant 0 : i32
    return %arg0, %c0_i32 : i32, i32
  }
  func.func @transform_1(%arg0: i32) -> (i32, i32) {
    %c0_i32 = arith.constant 0 : i32
    %c0_i32_0 = arith.constant 0 : i32
    %c0_i32_1 = arith.constant 0 : i32
    return %c0_i32, %c0_i32_0 : i32, i32
  }
  func.func @transform_2(%arg0: i32) -> (i32, i32) {
    %c0_i32 = arith.constant 0 : i32
    %c0_i32_0 = arith.constant 0 : i32
    %c0_i32_1 = arith.constant 0 : i32
    return %c0_i32, %c0_i32_0 : i32, i32
  }
  func.func @transform_3(%arg0: i32) -> (i32, i32) {
    %c0_i32 = arith.constant 0 : i32
    %c0_i32_0 = arith.constant 0 : i32
    %c0_i32_1 = arith.constant 0 : i32
    return %c0_i32, %c0_i32_0 : i32, i32
  }
  func.func @transform_4(%arg0: i32) -> (i32, i32) {
    %c0_i32 = arith.constant 0 : i32
    %c0_i32_0 = arith.constant 0 : i32
    %c0_i32_1 = arith.constant 0 : i32
    return %c0_i32, %c0_i32_0 : i32, i32
  }
  func.func @transform_5(%arg0: i32) -> (i32, i32) {
    %c0_i32 = arith.constant 0 : i32
    %c0_i32_0 = arith.constant 0 : i32
    return %arg0, %c0_i32 : i32, i32
  }
}

</mosaic_0001>

<bundles_post_ra>
// kernel: tpu_custom_call.1
= control target key start
LH: loop header
LB: loop body
LE: loop exit
PB: predicated region body
PF: predicated region fallthrough
CT: control target
= control target key end

     0   :  { %vm36_vm0 = vcmask 1044480   ;;  %v308_v0 = vmov 0.0|0.0   ;;  %vm309_vm1 = vmmov 1   ;;  %vm310_vm3 = vmmov 0   ;;  %s408_s1 = inlined_call_operand.vmem [shape: f32[13,128], index: 1, kind: input, shape index: {}]   ;;  %s409_s3 = inlined_call_operand.vmem [shape: f32[128,1], index: 3, kind: input, shape index: {}]   ;;  %s410_s0 = inlined_call_operand.vmem [shape: f32[8,13], index: 0, kind: input, shape index: {}]   ;;  %s411_s4 = inlined_call_operand.<no memory space> [shape: f32[1,1], index: 4, kind: input, shape index: {}]   ;;  %s412_s2 = inlined_call_operand.vmem [shape: f32[1,128], index: 2, kind: input, shape index: {}]   ;;  %s413_s5 = inlined_call_operand.vmem [shape: f32[8,1], index: 5, kind: output, shape index: {}]  }
   0x1   :  { %276 = vmatprep.subr.bf16.mxu0 %v308_v0  ;;  %v23_v1 = vld [vmem:[%s408_s1] sm:$0xff]  ;;  %v24_v2 = vld [vmem:[%s408_s1 + $0x8] sm:$0x1f]  ;;  %vm278_vm2 = vmpackc.low %vm36_vm0, %vm309_vm1  ;;  %280 = vmatprep.subr.bf16.mxu1 %v308_v0  ;;  %v311_v4 = vmov 0.0   ;;  %vm32_vm4 = vcmask 105472   ;;  %v10_v30 = vstv %s411_s4  ;;  %vm204_vm5 = vcmask 7168  }
   0x2   :  { %v277_v3 = vpack.c.bf16 %v24_v2, %v23_v1  ;;  %238 = vmatprep.mubr.msk.f32.mxu0 %vm310_vm3, %v311_v4  ;;  %v111_v5 = vld [vmem:[%s409_s3] sm:$0xff]  ;;  %v112_v6 = vld [vmem:[%s409_s3 + $0x8] sm:$0xff]  ;;  %273 = vmatprep.mubr.msk.f32.mxu1 %vm310_vm3, %v311_v4  ;;  %v113_v8 = vld [vmem:[%s409_s3 + $0x10] sm:$0xff]  ;;  %11 = vst [vmem:[#allocation2] sm:$0x1] %v10_v30 }
   0x3   :  { %v281_v7 = vpack.c.bf16 %v112_v6, %v111_v5  ;;  %v114_v9 = vld [vmem:[%s409_s3 + $0x18] sm:$0xff]  ;;  %v22_v10 = vld [vmem:[%s410_s0] sm:$0xff]  ;;  %v116_v13 = vld [vmem:[%s409_s3 + $0x28] sm:$0xff] }
   0x4   :  { %279 = vmatpush3.bf16.msk.msra.mxu0 %vm278_vm2, %v277_v3  ;;  %v284_v11 = vpack.c.bf16 %v114_v9, %v113_v8  ;;  %v115_v12 = vld [vmem:[%s409_s3 + $0x20] sm:$0xff]  ;;  %v117_v15 = vld [vmem:[%s409_s3 + $0x30] sm:$0xff]  ;;  %v118_v16 = vld [vmem:[%s409_s3 + $0x38] sm:$0xff] }
   0x5   :  { %282 = vmatpush3.bf16.msra.mxu1 %v281_v7  ;;  %v287_v14 = vpack.c.bf16 %v116_v13, %v115_v12  ;;  %v290_v17 = vpack.c.bf16 %v118_v16, %v117_v15  ;;  %v119_v18 = vld [vmem:[%s409_s3 + $0x40] sm:$0xff]  ;;  %v120_v19 = vld [vmem:[%s409_s3 + $0x48] sm:$0xff]  ;;  %v121_v21 = vld [vmem:[%s409_s3 + $0x50] sm:$0xff] }
   0x6   :  { %283 = vmatprep.subr.bf16.mxu1 %v308_v0  ;;  %v293_v20 = vpack.c.bf16 %v120_v19, %v119_v18  ;;  %v122_v22 = vld [vmem:[%s409_s3 + $0x58] sm:$0xff]  ;;  %v123_v24 = vld [vmem:[%s409_s3 + $0x60] sm:$0xff]  ;;  %v124_v25 = vld [vmem:[%s409_s3 + $0x68] sm:$0xff] }
   0x7   :  { %239 = vmatmul.mubr.msk.f32.vlgmr.msra.gmra.mrb[0].mxu0 %vm32_vm4, %v22_v10  ;;  %v296_v23 = vpack.c.bf16 %v122_v22, %v121_v21  ;;  %v299_v26 = vpack.c.bf16 %v124_v25, %v123_v24  ;;  %v125_v27 = vld [vmem:[%s409_s3 + $0x70] sm:$0xff]  ;;  %v126_v28 = vld [vmem:[%s409_s3 + $0x78] sm:$0xff]  ;;  %v210_v31 = vld [vmem:[%s412_s2] ss:$0 sm:$0xff] }
   0x8   :  { %v302_v29 = vpack.c.bf16 %v126_v28, %v125_v27 }
   0x9   :  { %285 = vmatpush3.bf16.msra.mxu1 %v284_v11  ;;  %v213_v36 = vld [vmem:[#allocation2] ss:$0 sm:$0xff] }
   0xa   :  { %286 = vmatprep.subr.bf16.mxu1 %v308_v0 }
   0xd   :  { %288 = vmatpush3.bf16.msra.mxu1 %v287_v14 }
   0xe   :  { %289 = vmatprep.subr.bf16.mxu1 %v308_v0 }
  0x11   :  { %291 = vmatpush3.bf16.msra.mxu1 %v290_v17 }
  0x12   :  { %292 = vmatprep.subr.bf16.mxu1 %v308_v0 }
  0x15   :  { %294 = vmatpush3.bf16.msra.mxu1 %v293_v20 }
  0x16   :  { %295 = vmatprep.subr.bf16.mxu1 %v308_v0 }
  0x19   :  { %297 = vmatpush3.bf16.msra.mxu1 %v296_v23 }
  0x1a   :  { %298 = vmatprep.subr.bf16.mxu1 %v308_v0 }
  0x1d   :  { %300 = vmatpush3.bf16.msra.mxu1 %v299_v26 }
  0x1e   :  { %301 = vmatprep.subr.bf16.mxu1 %v308_v0 }
  0x21   :  { %303 = vmatpush3.bf16.msra.mxu1 %v302_v29 }
  0xda   :  { %v106_v32 = vpop.f32.mrb[0].mxu0 }
  0xdb   :  { %v107_v33 = vadd.f32 %v210_v31, %v106_v32  ;;  %v240_v34 = vpop.f32.mrb[1].mxu0 }
  0xdd   :  { %v110_v35 = vmax.f32 %v107_v33, 0.0 }
  0xdf   :  { %274 = vmatmul.mubr.f32.vlgmr.msra.gmra.mrb[0].mxu1 %v110_v35 }
 0x1b2   :  { %v200_v37 = vpop.f32.mrb[0].mxu1 }
 0x1b3   :  { %v201_v38 = vadd.f32 %v213_v36, %v200_v37  ;;  %v275_v39 = vpop.f32.mrb[1].mxu1 }
 0x1b5   :  { %205 = vst.msk [vmem:[%s413_s5] sm:$0xff] %vm204_vm5, %v201_v38 }

</bundles_post_ra>
